<compile_context>
chip_gen: v6e
topology: v6e:2x2x1
jax: 0.10.0
libtpu: 0.0.40
codegen_flags: <defaults>
</compile_context>

<pallas_src>
import jax
import jax.numpy as jnp
import numpy as np
from jax.experimental import pallas as pl
from jax.experimental.pallas import tpu as pltpu  # noqa: F401  (TPU backend)

# ---------------- model sizes (small, consistent with the module) -----------
B = 2          # batch
N = 16         # number of graph nodes
F0 = 1         # input feature dim  (GNN(1, hidden_dim, ...))
H = 32         # hidden_dim
FF = 64        # hidden_dim_ffnn
C = 11         # n_classes
K = 1          # k-hop order of the graph filter
LANES = 128    # lane width for the packed parameter slab / padded output

# ---------------- parameter-slab row offsets (8-row aligned) ----------------
W1_OFF = 0                      # (K+1)*F0 = 2 rows, cols [0:H]
B1_OFF = 8                      # 1 row,             cols [0:H]
W2_OFF = 16                     # (K+1)*H  = 64 rows, cols [0:H]
B2_OFF = 80                     # 1 row,             cols [0:H]
WENC_OFF = 88                   # H = 32 rows,       cols [0:FF]
BENC_OFF = 120                  # 1 row,             cols [0:FF]
WOUT_OFF = 128                  # FF = 64 rows,      cols [0:C] (rest zero)
BOUT_OFF = 192                  # 1 row,             cols [0:C] (rest zero)
SLAB_ROWS = 200


def backbone_kernel(x_ref, s_ref, p_ref, out_ref):
    """Single program: processes all B graphs; out_ref is [B, 128] lane-dense."""
    # Static slices of the packed parameter slab (zero runtime cost views).
    b1 = p_ref[B1_OFF:B1_OFF + 1, 0:H]              # [1, H]
    b2 = p_ref[B2_OFF:B2_OFF + 1, 0:H]              # [1, H]
    wenc = p_ref[WENC_OFF:WENC_OFF + H, 0:FF]       # [H, FF]
    benc = p_ref[BENC_OFF:BENC_OFF + 1, 0:FF]       # [1, FF]
    wout = p_ref[WOUT_OFF:WOUT_OFF + FF, :]         # [FF, 128] zero-padded > C
    bout = p_ref[BOUT_OFF:BOUT_OFF + 1, :]          # [1, 128]  zero-padded > C

    for b in range(B):                              # static unrolled batch loop
        x = x_ref[b]                                # [N, F0] = [16, 1]
        S = s_ref[b]                                # [N, N]

        # ---- GNN layer 1 + ReLU : fin == 1, projections on the VPU ----
        taps = [x]
        xi = x
        for _ in range(K):
            xi = jnp.dot(S, xi, preferred_element_type=jnp.float32)  # [N, 1]
            taps.append(xi)
        h1 = b1
        for i in range(K + 1):
            # outer product via broadcast multiply: [N,1] * [1,H] -> [N,H]
            h1 = h1 + taps[i] * p_ref[W1_OFF + i:W1_OFF + i + 1, 0:H]
        h1 = jnp.maximum(h1, 0.0)                   # [N, H]

        # ---- GNN layer 2 + ReLU : genuine 2-D contractions on the MXU ----
        taps2 = [h1]
        hi = h1
        for _ in range(K):
            hi = jnp.dot(S, hi, preferred_element_type=jnp.float32)  # [N, H]
            taps2.append(hi)
        h2 = b2
        for i in range(K + 1):
            h2 = h2 + jnp.dot(
                taps2[i],
                p_ref[W2_OFF + i * H:W2_OFF + (i + 1) * H, 0:H],
                preferred_element_type=jnp.float32)
        h2 = jnp.maximum(h2, 0.0)                   # [N, H]

        # ---- max-pool over nodes (torch: x.max(dim=1)[0]) ----
        g = jnp.max(h2, axis=0, keepdims=True)      # [1, H]

        # ---- enc -> ReLU -> out (lane-dense, Wout/bout padded to 128) ----
        e = jnp.dot(g, wenc, preferred_element_type=jnp.float32) + benc
        e = jnp.maximum(e, 0.0)                     # [1, FF]
        o = jnp.dot(e, wout, preferred_element_type=jnp.float32) + bout  # [1,128]
        out_ref[pl.ds(b, 1), :] = o


def backbone_forward(x, lower, slab):
    """x: [B,N,F0], lower: [B,N,N], slab: [SLAB_ROWS, 128] packed params."""
    out_padded = pl.pallas_call(
        backbone_kernel,
        out_shape=jax.ShapeDtypeStruct((B, LANES), jnp.float32),
        # No grid: one program, whole arrays resident in VMEM (total < 110 KiB).
    )(x, lower, slab)
    return out_padded[:, :C]


# ---------------------------- host-side helpers ------------------------------
def pack_params(params):
    """Pack all weights/biases into one lane-padded f32 slab [SLAB_ROWS, 128]."""
    (w1, b1, w2, b2, wenc, benc, wout, bout) = params
    slab = jnp.zeros((SLAB_ROWS, LANES), jnp.float32)
    for arr, off in ((w1, W1_OFF), (b1, B1_OFF), (w2, W2_OFF), (b2, B2_OFF),
                     (wenc, WENC_OFF), (benc, BENC_OFF),
                     (wout, WOUT_OFF), (bout, BOUT_OFF)):
        r, c = arr.shape
        slab = slab.at[off:off + r, 0:c].set(arr)
    return slab


def reference_forward(x, lower, params):
    """Plain-JAX reference of the same forward semantics."""
    (w1, b1, w2, b2, wenc, benc, wout, bout) = params

    def gnn(x, S, W, b):
        taps = [x]
        xi = x
        for _ in range(K):
            xi = jnp.einsum('bij,bjf->bif', S, xi)
            taps.append(xi)
        z = jnp.concatenate(taps, axis=-1)
        return jnp.einsum('bnf,fh->bnh', z, W) + b

    h = jax.nn.relu(gnn(x, lower, w1, b1))
    h = jax.nn.relu(gnn(h, lower, w2, b2))
    g = jnp.max(h, axis=1)                       # [B, H]
    e = jax.nn.relu(g @ wenc + benc)
    return e @ wout + bout


def init_params(key):
    ks = jax.random.split(key, 8)

    def lin(k, fan_in, shape):
        return jax.random.normal(k, shape, jnp.float32) / np.sqrt(fan_in)

    w1 = lin(ks[0], (K + 1) * F0, ((K + 1) * F0, H))
    b1 = lin(ks[1], H, (1, H)) * 0.1
    w2 = lin(ks[2], (K + 1) * H, ((K + 1) * H, H))
    b2 = lin(ks[3], H, (1, H)) * 0.1
    wenc = lin(ks[4], H, (H, FF))
    benc = lin(ks[5], FF, (1, FF)) * 0.1
    wout = lin(ks[6], FF, (FF, C))
    bout = lin(ks[7], C, (1, C)) * 0.1
    return (w1, b1, w2, b2, wenc, benc, wout, bout)


if __name__ == "__main__":
    key = jax.random.PRNGKey(0)
    k_x, k_s, k_p = jax.random.split(key, 3)

    x = jax.random.normal(k_x, (B, N, F0), jnp.float32)
    # "lower": a lower-triangular graph shift operator (row-normalized-ish)
    lower = jnp.tril(jax.random.uniform(k_s, (B, N, N), jnp.float32)) / N
    params = init_params(k_p)
    slab = pack_params(params)

    out = backbone_forward(x, lower, slab)
    out = jax.block_until_ready(out)

    ref = reference_forward(x, lower, params)
    assert out.shape == (B, C), out.shape
    np.testing.assert_allclose(np.asarray(out), np.asarray(ref),
                               rtol=1e-4, atol=1e-4)
    print("KERNEL_OK")
</pallas_src>

<mosaic_0001>
module attributes {stable_mosaic.version = 11 : i64} {
  func.func @backbone_kernel(%arg0: memref<2x16x1xf32, #tpu.memory_space<vmem>>, %arg1: memref<2x16x16xf32, #tpu.memory_space<vmem>>, %arg2: memref<200x128xf32, #tpu.memory_space<vmem>>, %arg3: memref<2x128xf32, #tpu.memory_space<vmem>>) attributes {dimension_semantics = [], scalar_prefetch = 0 : i64, scratch_operands = 0 : i64, tpu.core_type = #tpu.core_type<tc>} {
    %c8 = arith.constant 8 : index
    %c0 = arith.constant 0 : index
    %0 = vector.load %arg2[%c8, %c0] : memref<200x128xf32, #tpu.memory_space<vmem>>, vector<1x32xf32>
    %c80 = arith.constant 80 : index
    %c0_0 = arith.constant 0 : index
    %1 = vector.load %arg2[%c80, %c0_0] : memref<200x128xf32, #tpu.memory_space<vmem>>, vector<1x32xf32>
    %c88 = arith.constant 88 : index
    %c0_1 = arith.constant 0 : index
    %2 = vector.load %arg2[%c88, %c0_1] : memref<200x128xf32, #tpu.memory_space<vmem>>, vector<32x64xf32>
    %c120 = arith.constant 120 : index
    %c0_2 = arith.constant 0 : index
    %3 = vector.load %arg2[%c120, %c0_2] : memref<200x128xf32, #tpu.memory_space<vmem>>, vector<1x64xf32>
    %c128 = arith.constant 128 : index
    %c0_3 = arith.constant 0 : index
    %4 = vector.load %arg2[%c128, %c0_3] : memref<200x128xf32, #tpu.memory_space<vmem>>, vector<64x128xf32>
    %c192 = arith.constant 192 : index
    %c0_4 = arith.constant 0 : index
    %5 = vector.load %arg2[%c192, %c0_4] : memref<200x128xf32, #tpu.memory_space<vmem>>, vector<1x128xf32>
    %c0_5 = arith.constant 0 : index
    %c0_6 = arith.constant 0 : index
    %c0_7 = arith.constant 0 : index
    %6 = vector.load %arg0[%c0_5, %c0_6, %c0_7] : memref<2x16x1xf32, #tpu.memory_space<vmem>>, vector<1x16x1xf32>
    %7 = vector.shape_cast %6 : vector<1x16x1xf32> to vector<16x1xf32>
    %c0_8 = arith.constant 0 : index
    %c0_9 = arith.constant 0 : index
    %c0_10 = arith.constant 0 : index
    %8 = vector.load %arg1[%c0_8, %c0_9, %c0_10] : memref<2x16x16xf32, #tpu.memory_space<vmem>>, vector<1x16x16xf32>
    %9 = vector.shape_cast %8 : vector<1x16x16xf32> to vector<16x16xf32>
    %cst = arith.constant dense<0.000000e+00> : vector<16x1xf32>
    %10 = tpu.matmul %9, %7, %cst {dimension_numbers = #tpu.dot_dimension_numbers<[1], [0], [0], [1], [0, 0, 1, 1], [], []>} : vector<16x16xf32>, vector<16x1xf32>, vector<16x1xf32> -> vector<16x1xf32>
    %c0_11 = arith.constant 0 : index
    %c0_12 = arith.constant 0 : index
    %11 = vector.load %arg2[%c0_11, %c0_12] : memref<200x128xf32, #tpu.memory_space<vmem>>, vector<1x32xf32>
    %12 = vector.broadcast %7 : vector<16x1xf32> to vector<16x32xf32>
    %13 = vector.broadcast %11 : vector<1x32xf32> to vector<16x32xf32>
    %14 = arith.mulf %12, %13 : vector<16x32xf32>
    %15 = vector.broadcast %0 : vector<1x32xf32> to vector<16x32xf32>
    %16 = arith.addf %15, %14 : vector<16x32xf32>
    %c1 = arith.constant 1 : index
    %c0_13 = arith.constant 0 : index
    %17 = vector.load %arg2[%c1, %c0_13] : memref<200x128xf32, #tpu.memory_space<vmem>>, vector<1x32xf32>
    %18 = vector.broadcast %10 : vector<16x1xf32> to vector<16x32xf32>
    %19 = vector.broadcast %17 : vector<1x32xf32> to vector<16x32xf32>
    %20 = arith.mulf %18, %19 : vector<16x32xf32>
    %21 = arith.addf %16, %20 : vector<16x32xf32>
    %cst_14 = arith.constant 0.000000e+00 : f32
    %22 = vector.broadcast %cst_14 : f32 to vector<16x32xf32>
    %23 = arith.maximumf %21, %22 : vector<16x32xf32>
    %cst_15 = arith.constant dense<0.000000e+00> : vector<16x32xf32>
    %24 = tpu.matmul %9, %23, %cst_15 {dimension_numbers = #tpu.dot_dimension_numbers<[1], [0], [0], [1], [0, 0, 1, 1], [], []>} : vector<16x16xf32>, vector<16x32xf32>, vector<16x32xf32> -> vector<16x32xf32>
    %c16 = arith.constant 16 : index
    %c0_16 = arith.constant 0 : index
    %25 = vector.load %arg2[%c16, %c0_16] : memref<200x128xf32, #tpu.memory_space<vmem>>, vector<32x32xf32>
    %cst_17 = arith.constant dense<0.000000e+00> : vector<16x32xf32>
    %26 = tpu.matmul %23, %25, %cst_17 {dimension_numbers = #tpu.dot_dimension_numbers<[1], [0], [0], [1], [0, 0, 1, 1], [], []>} : vector<16x32xf32>, vector<32x32xf32>, vector<16x32xf32> -> vector<16x32xf32>
    %27 = vector.broadcast %1 : vector<1x32xf32> to vector<16x32xf32>
    %28 = arith.addf %27, %26 : vector<16x32xf32>
    %c48 = arith.constant 48 : index
    %c0_18 = arith.constant 0 : index
    %29 = vector.load %arg2[%c48, %c0_18] : memref<200x128xf32, #tpu.memory_space<vmem>>, vector<32x32xf32>
    %cst_19 = arith.constant dense<0.000000e+00> : vector<16x32xf32>
    %30 = tpu.matmul %24, %29, %cst_19 {dimension_numbers = #tpu.dot_dimension_numbers<[1], [0], [0], [1], [0, 0, 1, 1], [], []>} : vector<16x32xf32>, vector<32x32xf32>, vector<16x32xf32> -> vector<16x32xf32>
    %31 = arith.addf %28, %30 : vector<16x32xf32>
    %cst_20 = arith.constant 0.000000e+00 : f32
    %32 = vector.broadcast %cst_20 : f32 to vector<16x32xf32>
    %33 = arith.maximumf %31, %32 : vector<16x32xf32>
    %cst_21 = arith.constant dense<0xFF800000> : vector<32xf32>
    %34 = vector.multi_reduction <maximumf>, %33, %cst_21 [0] : vector<16x32xf32> to vector<32xf32>
    %35 = vector.shape_cast %34 : vector<32xf32> to vector<1x32xf32>
    %cst_22 = arith.constant dense<0.000000e+00> : vector<1x64xf32>
    %36 = tpu.matmul %35, %2, %cst_22 {dimension_numbers = #tpu.dot_dimension_numbers<[1], [0], [0], [1], [0, 0, 1, 1], [], []>} : vector<1x32xf32>, vector<32x64xf32>, vector<1x64xf32> -> vector<1x64xf32>
    %37 = arith.addf %36, %3 : vector<1x64xf32>
    %cst_23 = arith.constant 0.000000e+00 : f32
    %38 = vector.broadcast %cst_23 : f32 to vector<1x64xf32>
    %39 = arith.maximumf %37, %38 : vector<1x64xf32>
    %cst_24 = arith.constant dense<0.000000e+00> : vector<1x128xf32>
    %40 = tpu.matmul %39, %4, %cst_24 {dimension_numbers = #tpu.dot_dimension_numbers<[1], [0], [0], [1], [0, 0, 1, 1], [], []>} : vector<1x64xf32>, vector<64x128xf32>, vector<1x128xf32> -> vector<1x128xf32>
    %41 = arith.addf %40, %5 : vector<1x128xf32>
    %c0_25 = arith.constant 0 : index
    %c0_26 = arith.constant 0 : index
    %42 = vector.load %arg3[%c0_25, %c0_26] : memref<2x128xf32, #tpu.memory_space<vmem>>, vector<1x128xf32>
    tpu.vector_store %arg3[%c0_25, %c0_26], %41 {strides = array<i32>} : memref<2x128xf32, #tpu.memory_space<vmem>>, vector<1x128xf32>,
    %c1_27 = arith.constant 1 : index
    %c0_28 = arith.constant 0 : index
    %c0_29 = arith.constant 0 : index
    %43 = vector.load %arg0[%c1_27, %c0_28, %c0_29] : memref<2x16x1xf32, #tpu.memory_space<vmem>>, vector<1x16x1xf32>
    %44 = vector.shape_cast %43 : vector<1x16x1xf32> to vector<16x1xf32>
    %c1_30 = arith.constant 1 : index
    %c0_31 = arith.constant 0 : index
    %c0_32 = arith.constant 0 : index
    %45 = vector.load %arg1[%c1_30, %c0_31, %c0_32] : memref<2x16x16xf32, #tpu.memory_space<vmem>>, vector<1x16x16xf32>
    %46 = vector.shape_cast %45 : vector<1x16x16xf32> to vector<16x16xf32>
    %cst_33 = arith.constant dense<0.000000e+00> : vector<16x1xf32>
    %47 = tpu.matmul %46, %44, %cst_33 {dimension_numbers = #tpu.dot_dimension_numbers<[1], [0], [0], [1], [0, 0, 1, 1], [], []>} : vector<16x16xf32>, vector<16x1xf32>, vector<16x1xf32> -> vector<16x1xf32>
    %c0_34 = arith.constant 0 : index
    %c0_35 = arith.constant 0 : index
    %48 = vector.load %arg2[%c0_34, %c0_35] : memref<200x128xf32, #tpu.memory_space<vmem>>, vector<1x32xf32>
    %49 = vector.broadcast %44 : vector<16x1xf32> to vector<16x32xf32>
    %50 = vector.broadcast %48 : vector<1x32xf32> to vector<16x32xf32>
    %51 = arith.mulf %49, %50 : vector<16x32xf32>
    %52 = vector.broadcast %0 : vector<1x32xf32> to vector<16x32xf32>
    %53 = arith.addf %52, %51 : vector<16x32xf32>
    %c1_36 = arith.constant 1 : index
    %c0_37 = arith.constant 0 : index
    %54 = vector.load %arg2[%c1_36, %c0_37] : memref<200x128xf32, #tpu.memory_space<vmem>>, vector<1x32xf32>
    %55 = vector.broadcast %47 : vector<16x1xf32> to vector<16x32xf32>
    %56 = vector.broadcast %54 : vector<1x32xf32> to vector<16x32xf32>
    %57 = arith.mulf %55, %56 : vector<16x32xf32>
    %58 = arith.addf %53, %57 : vector<16x32xf32>
    %cst_38 = arith.constant 0.000000e+00 : f32
    %59 = vector.broadcast %cst_38 : f32 to vector<16x32xf32>
    %60 = arith.maximumf %58, %59 : vector<16x32xf32>
    %cst_39 = arith.constant dense<0.000000e+00> : vector<16x32xf32>
    %61 = tpu.matmul %46, %60, %cst_39 {dimension_numbers = #tpu.dot_dimension_numbers<[1], [0], [0], [1], [0, 0, 1, 1], [], []>} : vector<16x16xf32>, vector<16x32xf32>, vector<16x32xf32> -> vector<16x32xf32>
    %c16_40 = arith.constant 16 : index
    %c0_41 = arith.constant 0 : index
    %62 = vector.load %arg2[%c16_40, %c0_41] : memref<200x128xf32, #tpu.memory_space<vmem>>, vector<32x32xf32>
    %cst_42 = arith.constant dense<0.000000e+00> : vector<16x32xf32>
    %63 = tpu.matmul %60, %62, %cst_42 {dimension_numbers = #tpu.dot_dimension_numbers<[1], [0], [0], [1], [0, 0, 1, 1], [], []>} : vector<16x32xf32>, vector<32x32xf32>, vector<16x32xf32> -> vector<16x32xf32>
    %64 = vector.broadcast %1 : vector<1x32xf32> to vector<16x32xf32>
    %65 = arith.addf %64, %63 : vector<16x32xf32>
    %c48_43 = arith.constant 48 : index
    %c0_44 = arith.constant 0 : index
    %66 = vector.load %arg2[%c48_43, %c0_44] : memref<200x128xf32, #tpu.memory_space<vmem>>, vector<32x32xf32>
    %cst_45 = arith.constant dense<0.000000e+00> : vector<16x32xf32>
    %67 = tpu.matmul %61, %66, %cst_45 {dimension_numbers = #tpu.dot_dimension_numbers<[1], [0], [0], [1], [0, 0, 1, 1], [], []>} : vector<16x32xf32>, vector<32x32xf32>, vector<16x32xf32> -> vector<16x32xf32>
    %68 = arith.addf %65, %67 : vector<16x32xf32>
    %cst_46 = arith.constant 0.000000e+00 : f32
    %69 = vector.broadcast %cst_46 : f32 to vector<16x32xf32>
    %70 = arith.maximumf %68, %69 : vector<16x32xf32>
    %cst_47 = arith.constant dense<0xFF800000> : vector<32xf32>
    %71 = vector.multi_reduction <maximumf>, %70, %cst_47 [0] : vector<16x32xf32> to vector<32xf32>
    %72 = vector.shape_cast %71 : vector<32xf32> to vector<1x32xf32>
    %cst_48 = arith.constant dense<0.000000e+00> : vector<1x64xf32>
    %73 = tpu.matmul %72, %2, %cst_48 {dimension_numbers = #tpu.dot_dimension_numbers<[1], [0], [0], [1], [0, 0, 1, 1], [], []>} : vector<1x32xf32>, vector<32x64xf32>, vector<1x64xf32> -> vector<1x64xf32>
    %74 = arith.addf %73, %3 : vector<1x64xf32>
    %cst_49 = arith.constant 0.000000e+00 : f32
    %75 = vector.broadcast %cst_49 : f32 to vector<1x64xf32>
    %76 = arith.maximumf %74, %75 : vector<1x64xf32>
    %cst_50 = arith.constant dense<0.000000e+00> : vector<1x128xf32>
    %77 = tpu.matmul %76, %4, %cst_50 {dimension_numbers = #tpu.dot_dimension_numbers<[1], [0], [0], [1], [0, 0, 1, 1], [], []>} : vector<1x64xf32>, vector<64x128xf32>, vector<1x128xf32> -> vector<1x128xf32>
    %78 = arith.addf %77, %5 : vector<1x128xf32>
    %c1_51 = arith.constant 1 : index
    %c0_52 = arith.constant 0 : index
    %79 = vector.load %arg3[%c1_51, %c0_52] : memref<2x128xf32, #tpu.memory_space<vmem>>, vector<1x128xf32>
    tpu.vector_store %arg3[%c1_51, %c0_52], %78 {strides = array<i32>} : memref<2x128xf32, #tpu.memory_space<vmem>>, vector<1x128xf32>,
    return
  }
}

</mosaic_0001>

<bundles_post_ra>
// kernel: tpu_custom_call.1
= control target key start
LH: loop header
LB: loop body
LE: loop exit
PB: predicated region body
PF: predicated region fallthrough
CT: control target
= control target key end

     0   :  { %8 = vsyncpa [#allocation3], 0  ;;  %s1669_s0 = inlined_call_operand.vmem [shape: f32[2,16,1], index: 0, kind: input, shape index: {}]   ;;  %s1670_s1 = inlined_call_operand.vmem [shape: f32[2,16,16], index: 1, kind: input, shape index: {}]   ;;  %s1671_s2 = inlined_call_operand.hbm [shape: f32[200,128], index: 2, kind: input, shape index: {}]   ;;  %s1672_s3 = inlined_call_operand.hbm [shape: f32[2,128], index: 3, kind: output, shape index: {}]  }
   0x1   :  { %9 = vsyncpa [#allocation4], 0  ;;  %s1422_s12 = smov [#allocation2]  }
   0x2   :  { %s19_s13 = sshll.u32 %s1422_s12, 4  ;;  %s20_s13 = int_to_ptr.vmem [resolvable:$true] %s19_s13 }
   0x3   :  { %s1386_s14 = scalar_lea.vmem %s20_s13, 3200  ;;  %p1391_p1 = scmp.lt.s32.totalorder %s20_s13, %s20_s13 }
   0x4   :  { %p1387_p0 = scmp.ne.s32.totalorder %s20_s13, %s1386_s14  ;;  %p1392_p2 = scmp.lt.s32.totalorder %s1386_s14, %s1386_s14 }
   0x6   :  { %p1393_p3 = por %p1392_p2, %p1391_p1 }
   0x8   :  { %p1394_p4 = pnand %p1393_p3, %p1387_p0 }
   0xa   :  { %1397 = shalt.err (!%p1394_p4)
}
   0xb   :  { %s1423_s15 = smov 128   ;;  %s1424_s16 = smov 8  }
   0xc   :  { %25 = dma.hbm_to_vmem [thread:$0]  %s1671_s2, 3200, %s20_s13, [#allocation3], %s1423_s15, %s1423_s15, %s1424_s16  }
   0xd   :  { %1418 = dma.done.wait [#allocation3], 3200  }
   0xe   :  { %1419 = vsyncadd [#allocation3], 4294964096  ;;  %v1425_v0 = vmov 0   ;;  %vm49_vm0 = vcmask 130048   ;;  %v46_v1 = vld [vmem:[%s1669_s0 + $0x8] sm:$0xff]  ;;  %v45_v2 = vld [vmem:[%s1669_s0] sm:$0xff] }
   0xf   :  { %1376 = vset.pattern.permute.xlu0 %v1425_v0  ;;  %1377 = vset.pattern.permute.xlu1 %v1425_v0  ;;  %v47_v3 = vld [vmem:[%s1670_s1] sm:$0xff]  ;;  %v48_v4 = vld [vmem:[%s1670_s1 + $0x8] sm:$0xff]  ;;  %v1470_v5 = vld [vmem:[%s1669_s0 + $0x18] sm:$0xff]  ;;  %vm254_vm1 = vcmask 261120   ;;  %v1426_v36 = vmov 0.0   ;;  %vm1427_vm2 = vmmov 0  }
  0x10   :  { %1237 = vmatprep.subr.mxu0 %v46_v1  ;;  %1241 = vmatprep.mubr.msk.f32.mxu0 %vm49_vm0, %v47_v3  ;;  %v1476_v8 = vld [vmem:[%s1669_s0 + $0x10] sm:$0xff]  ;;  %v1479_v9 = vld [vmem:[#allocation2 + $0x48] sm:$0xff]  ;;  %v1481_v10 = vld [vmem:[#allocation2 + $0x40] sm:$0xff]  ;;  %vm514_vm3 = vcmask 523264  }
  0x11   :  { %1238 = vmatpush3.msra.mxu0 %v46_v1  ;;  %139 = vperm.xlu0 %1376, %v46_v1   ;;  %v1487_v11 = vld [vmem:[#allocation2] ss:$0 sm:$0xff]  ;;  %v1490_v14 = vld [vmem:[#allocation2 + $0x8] ss:$0 sm:$0xff]  ;;  %v1492_v15 = vld [vmem:[#allocation2 + $0x1] ss:$0 sm:$0xff] }
  0x12   :  { %1239 = vmatprep.subr.mxu0 %v45_v2  ;;  %1262 = vmatprep.subr.mxu1 %v1479_v9  ;;  %v1499_v28 = vld [vmem:[#allocation2 + $0x28] sm:$0xff]  ;;  %v1501_v29 = vld [vmem:[#allocation2 + $0x20] sm:$0xff]  ;;  %v1507_v30 = vld [vmem:[#allocation2 + $0x18] sm:$0xff] }
  0x13   :  { %1240 = vmatpush3.msra.mxu0 %v45_v2  ;;  %1263 = vmatpush3.msra.mxu1 %v1479_v9  ;;  %v1511_v31 = vld [vmem:[#allocation2 + $0x10] sm:$0xff]  ;;  %v1518_v32 = vld [vmem:[#allocation2 + $0x38] sm:$0xff]  ;;  %v1534_v38 = vld [vmem:[#allocation2 + $0x68] sm:$0xff] }
  0x14   :  { %1242 = vmatmul.mubr.msk.f32.vlgmr.msra.gmra.mxu0 %vm49_vm0, %v48_v4  ;;  %1264 = vmatprep.subr.mxu1 %v1481_v10  ;;  %v1522_v33 = vld [vmem:[#allocation2 + $0x30] sm:$0xff]  ;;  %v1538_v39 = vld [vmem:[#allocation2 + $0x60] sm:$0xff]  ;;  %v1542_v40 = vld [vmem:[#allocation2 + $0x58] sm:$0xff] }
  0x15   :  { %134 = vperm.xlu0 %1376, %v45_v2   ;;  %1248 = vmatprep.mubr.msk.f32.mxu0 %vm49_vm0, %v47_v3  ;;  %v1529_v37 = vld [vmem:[#allocation2 + $0x70] sm:$0xff]  ;;  %v1550_v41 = vld [vmem:[#allocation2 + $0xb8] sm:$0xff]  ;;  %v1556_v43 = vld [vmem:[#allocation2 + $0xa8] sm:$0xff] }
  0x16   :  { %1265 = vmatpush3.msra.mxu1 %v1481_v10  ;;  %v1552_v42 = vld [vmem:[#allocation2 + $0xb0] sm:$0xff]  ;;  %v1560_v44 = vld [vmem:[#allocation2 + $0xa0] sm:$0xff]  ;;  %v1564_v45 = vld [vmem:[#allocation2 + $0x98] sm:$0xff] }
  0x17   :  { %1266 = vmatprep.subr.mxu1 %v1518_v32  ;;  %v1570_v47 = vld [vmem:[#allocation2 + $0x50] ss:$0 sm:$0xff]  ;;  %v1156_v3 = vld [vmem:[%s1670_s1 + $0x18] sm:$0xff] }
  0x18   :  { %1267 = vmatpush3.msra.mxu1 %v1518_v32  ;;  %v1155_v2 = vld [vmem:[%s1670_s1 + $0x10] sm:$0xff]  ;;  %s1428_s1 = smov [#allocation5]  }
  0x19   :  { %684 = vperm.xlu0 %1376, %v1470_v5   ;;  %1268 = vmatprep.subr.mxu1 %v1522_v33  ;;  %s1130_s6 = sshll.u32 %s1428_s1, 4  ;;  %s1131_s6 = int_to_ptr.vmem [resolvable:$true] %s1130_s6 }
  0x1a   :  { %1269 = vmatpush3.msra.mxu1 %v1522_v33  ;;  %s1398_s7 = scalar_lea.vmem %s1131_s6, 32  ;;  %p1403_p6 = scmp.lt.s32.totalorder %s1131_s6, %s1131_s6 }
  0x1b   :  { %1284 = vmatprep.subr.mxu1 %v1426_v36  ;;  %p1399_p5 = scmp.ne.s32.totalorder %s1131_s6, %s1398_s7  ;;  %p1404_p7 = scmp.lt.s32.totalorder %s1398_s7, %s1398_s7 }
  0x1d   :  { %p1405_p8 = por %p1404_p7, %p1403_p6 }
  0x1f   :  { %p1406_p9 = pnand %p1405_p8, %p1399_p5 }
  0x8c   :  { %v140_v12 = vpop.permute.xlu0 %139 }
  0x8d   :  { %v147_v13 = vmul.f32 %v1487_v11, %v140_v12 }
  0x8f   :  { %v153_v16 = vadd.f32 %v1490_v14, %v147_v13 }
  0x90   :  { %v135_v17 = vpop.permute.xlu0 %134 }
  0x91   :  { %v146_v19 = vmul.f32 %v1487_v11, %v135_v17 }
  0x93   :  { %v152_v23 = vadd.f32 %v1490_v14, %v146_v19 }
  0x94   :  { %v685_v19 = vpop.permute.xlu0 %684 }
  0xd4   :  { %v1243_v6 = vpop.f32.mrf.mxu0 }
  0xd5   :  { %162 = vperm.xlu1 %1377, %v1243_v6   ;;  %v1597_v6 = vld [vmem:[#allocation2 + $0x80] sm:$0xff] }
  0xd6   :  { %v122_v7 = vpop.f32.mrf.mxu0 }
  0xd9   :  { %157 = vperm.xlu1 %1377, %v122_v7   ;;  %v1601_v7 = vld [vmem:[#allocation2 + $0x78] sm:$0x1] }
  0xdd   :  { %679 = vperm.xlu1 %1377, %v1476_v8  }
 0x150   :  { %v163_v18 = vpop.permute.xlu1 %162 }
 0x151   :  { %v170_v20 = vmul.f32 %v1492_v15, %v163_v18 }
 0x153   :  { %v172_v21 = vadd.f32 %v170_v20, %v153_v16 }
 0x154   :  { %v158_v22 = vpop.permute.xlu1 %157 }
 0x155   :  { %v174_v24 = vmax.f32 %v172_v21, 0.0  ;;  %v169_v25 = vmul.f32 %v1492_v15, %v158_v22  ;;  %v692_v21 = vmul.f32 %v1487_v11, %v685_v19 }
 0x157   :  { %v171_v26 = vadd.f32 %v169_v25, %v152_v23  ;;  %1244 = vmatprep.subr.mxu0 %v174_v24  ;;  %v694_v23 = vadd.f32 %v1490_v14, %v692_v21 }
 0x158   :  { %1245 = vmatpush3.msra.mxu0 %v174_v24  ;;  %v680_v20 = vpop.permute.xlu1 %679 }
 0x159   :  { %v173_v27 = vmax.f32 %v171_v26, 0.0 }
 0x15b   :  { %1246 = vmatprep.subr.mxu0 %v173_v27 }
 0x15c   :  { %1247 = vmatpush3.msra.mxu0 %v173_v27 }
 0x15d   :  { %1249 = vmatmul.mubr.msk.f32.vlgmr.msra.gmra.mxu0 %vm49_vm0, %v48_v4  ;;  %1251 = vmatprep.subr.mxu0 %v1499_v28  ;;  %v1589_v4 = vld [vmem:[#allocation2 + $0x90] sm:$0xff] }
 0x15e   :  { %1252 = vmatpush3.msra.mxu0 %v1499_v28  ;;  %1259 = vmatprep.mubr.msk.f32.mxu0 %vm254_vm1, %v173_v27 }
 0x15f   :  { %1253 = vmatprep.subr.mxu0 %v1501_v29 }
 0x160   :  { %1254 = vmatpush3.msra.mxu0 %v1501_v29 }
 0x161   :  { %1255 = vmatprep.subr.mxu0 %v1507_v30 }
 0x162   :  { %1256 = vmatpush3.msra.mxu0 %v1507_v30 }
 0x163   :  { %1257 = vmatprep.subr.mxu0 %v1511_v31 }
 0x164   :  { %1258 = vmatpush3.msra.mxu0 %v1511_v31 }
 0x165   :  { %1260 = vmatmul.mubr.msk.f32.vlgmr.msra.gmra.mxu0 %vm254_vm1, %v174_v24  ;;  %1273 = vmatprep.subr.mxu0 %v1426_v36 }
 0x166   :  { %1274 = vmatpush3.msra.mxu0 %v1529_v37  ;;  %1281 = vmatprep.mubr.msk.f32.mxu0 %vm1427_vm2, %v1426_v36 }
 0x167   :  { %1275 = vmatprep.subr.mxu0 %v1426_v36 }
 0x168   :  { %1276 = vmatpush3.msra.mxu0 %v1534_v38 }
 0x169   :  { %1277 = vmatprep.subr.mxu0 %v1426_v36 }
 0x16a   :  { %1278 = vmatpush3.msra.mxu0 %v1538_v39 }
 0x16b   :  { %1279 = vmatprep.subr.mxu0 %v1426_v36 }
 0x16c   :  { %1280 = vmatpush3.msra.mxu0 %v1542_v40 }
 0x16d   :  { %1303 = vmatprep.subr.mxu0 %v1470_v5 }
 0x21d   :  { %v1250_v34 = vpop.f32.mrf.mxu0 }
 0x21f   :  { %v241_v35 = vpop.f32.mrf.mxu0 }
 0x220   :  { %1270 = vmatprep.mubr.msk.f32.mxu1 %vm254_vm1, %v241_v35 }
 0x221   :  { %1271 = vmatmul.mubr.msk.f32.vlgmr.msra.gmra.mxu1 %vm254_vm1, %v1250_v34 }
 0x222   :  { %1300 = vmatprep.mubr.msk.f32.mxu1 %vm1427_vm2, %v1426_v36  ;;  %1285 = vmatpush3.msra.mxu1 %v1550_v41 }
 0x223   :  { %1286 = vmatprep.subr.mxu1 %v1426_v36 }
 0x224   :  { %1287 = vmatpush3.msra.mxu1 %v1552_v42 }
 0x225   :  { %1288 = vmatprep.subr.mxu1 %v1426_v36  ;;  %v1261_v46 = vpop.f32.mrf.mxu0 }
 0x226   :  { %1289 = vmatpush3.msra.mxu1 %v1556_v43  ;;  %v341_v49 = vadd.f32 %v1261_v46, %v1570_v47 }
 0x227   :  { %1290 = vmatprep.subr.mxu1 %v1426_v36  ;;  %v327_v48 = vpop.f32.mrf.mxu0 }
 0x228   :  { %1291 = vmatpush3.msra.mxu1 %v1560_v44  ;;  %v340_v51 = vadd.f32 %v1570_v47, %v327_v48 }
 0x229   :  { %1292 = vmatprep.subr.mxu1 %v1426_v36 }
 0x22a   :  { %1293 = vmatpush3.msra.mxu1 %v1564_v45 }
 0x22b   :  { %1294 = vmatprep.subr.mxu1 %v1426_v36 }
 0x22c   :  { %1295 = vmatpush3.msra.mxu1 %v1589_v4 }
 0x22d   :  { %1296 = vmatprep.subr.mxu1 %v1426_v36 }
 0x2e1   :  { %v1272_v50 = vpop.f32.mrf.mxu1 }
 0x2e2   :  { %v428_v52 = vadd.f32 %v1272_v50, %v341_v49 }
 0x2e3   :  { %v418_v53 = vpop.f32.mrf.mxu1 }
 0x2e4   :  { %v430_v54 = vmax.f32 %v428_v52, 0.0  ;;  %v427_v55 = vadd.f32 %v418_v53, %v340_v51 }
 0x2e6   :  { %v429_v56 = vmax.f32 %v427_v55, 0.0  ;;  %v432_v57 = vsel %vm254_vm1, %v430_v54, -inf }
 0x2e8   :  { %v431_v58 = vsel %vm254_vm1, %v429_v56, -inf }
 0x2e9   :  { %v433_v59 = vmax.f32 %v431_v58, %v432_v57 }
 0x2eb   :  { %v434_v60 = vrot.slane %v433_v59, 4 }
 0x2ed   :  { %v435_v61 = vmax.f32 %v433_v59, %v434_v60 }
 0x2ef   :  { %v436_v62 = vrot.slane %v435_v61, 2 }
 0x2f1   :  { %v437_v63 = vmax.f32 %v435_v61, %v436_v62 }
 0x2f3   :  { %v438_v0 = vrot.slane %v437_v63, 1 }
 0x2f5   :  { %v439_v1 = vmax.f32 %v437_v63, %v438_v0 }
 0x2f7   :  { %1282 = vmatmul.mubr.msk.f32.vlgmr.msra.gmra.mxu0 %vm254_vm1, %v439_v1 }
 0x2f8   :  { %1304 = vmatpush3.msra.mxu0 %v1470_v5  ;;  %1307 = vmatprep.mubr.msk.f32.mxu0 %vm49_vm0, %v1155_v2  ;;  %v1593_v5 = vld [vmem:[#allocation2 + $0x88] sm:$0xff] }
 0x2f9   :  { %1305 = vmatprep.subr.mxu0 %v1476_v8  ;;  %1297 = vmatpush3.msra.mxu1 %v1593_v5 }
 0x2fa   :  { %1306 = vmatpush3.msra.mxu0 %v1476_v8  ;;  %1298 = vmatprep.subr.mxu1 %v1426_v36 }
 0x2fb   :  { %1308 = vmatmul.mubr.msk.f32.vlgmr.msra.gmra.mxu0 %vm49_vm0, %v1156_v3  ;;  %1299 = vmatpush3.msra.mxu1 %v1597_v6 }
 0x2fc   :  { %1314 = vmatprep.mubr.msk.f32.mxu0 %vm49_vm0, %v1155_v2  ;;  %1328 = vmatprep.subr.mxu1 %v1479_v9 }
 0x3b7   :  { %v509_v8 = vpop.f32.mrf.mxu0 }
 0x3b8   :  { %v510_v12 = vadd.f32 %v509_v8, %v1601_v7 }
 0x3b9   :  { %v1283_v13 = vpop.f32.mrf.mxu0 }
 0x3ba   :  { %v513_v16 = vmax.f32 %v510_v12, 0.0 }
 0x3bb   :  { %v1309_v17 = vpop.f32.mrf.mxu0 }
 0x3bc   :  { %1301 = vmatmul.mubr.msk.f32.vlgmr.msra.gmra.mxu1 %vm514_vm3, %v513_v16  ;;  %703 = vperm.xlu0 %1376, %v1309_v17  }
 0x3bd   :  { %v667_v18 = vpop.f32.mrf.mxu0  ;;  %1329 = vmatpush3.msra.mxu1 %v1479_v9  ;;  %v691_v9 = vmul.f32 %v1487_v11, %v680_v20  ;;  %v44_v11 = vld [vmem:[#allocation2 + $0xc0] sm:$0x1] }
 0x3be   :  { %698 = vperm.xlu1 %1377, %v667_v18   ;;  %1330 = vmatprep.subr.mxu1 %v1481_v10 }
 0x3bf   :  { %1331 = vmatpush3.msra.mxu1 %v1481_v10  ;;  %v693_v25 = vadd.f32 %v1490_v14, %v691_v9 }
 0x3c0   :  { %1332 = vmatprep.subr.mxu1 %v1518_v32 }
 0x3c1   :  { %1333 = vmatpush3.msra.mxu1 %v1518_v32 }
 0x3c2   :  { %1334 = vmatprep.subr.mxu1 %v1522_v33 }
 0x3c3   :  { %1335 = vmatpush3.msra.mxu1 %v1522_v33 }
 0x3c4   :  { %1350 = vmatprep.subr.mxu1 %v1426_v36 }
 0x437   :  { %v704_v22 = vpop.permute.xlu0 %703 }
 0x438   :  { %v711_v10 = vmul.f32 %v1492_v15, %v704_v22 }
 0x439   :  { %v699_v24 = vpop.permute.xlu1 %698 }
 0x43a   :  { %v713_v26 = vadd.f32 %v711_v10, %v694_v23  ;;  %v710_v27 = vmul.f32 %v1492_v15, %v699_v24 }
 0x43c   :  { %v715_v32 = vmax.f32 %v713_v26, 0.0  ;;  %v712_v33 = vadd.f32 %v710_v27, %v693_v25 }
 0x43e   :  { %v714_v34 = vmax.f32 %v712_v33, 0.0  ;;  %1310 = vmatprep.subr.mxu0 %v715_v32 }
 0x43f   :  { %1311 = vmatpush3.msra.mxu0 %v715_v32 }
 0x440   :  { %1312 = vmatprep.subr.mxu0 %v714_v34 }
 0x441   :  { %1313 = vmatpush3.msra.mxu0 %v714_v34 }
 0x442   :  { %1315 = vmatmul.mubr.msk.f32.vlgmr.msra.gmra.mxu0 %vm49_vm0, %v1156_v3  ;;  %1317 = vmatprep.subr.mxu0 %v1499_v28 }
 0x443   :  { %1318 = vmatpush3.msra.mxu0 %v1499_v28  ;;  %1325 = vmatprep.mubr.msk.f32.mxu0 %vm254_vm1, %v714_v34 }
 0x444   :  { %1319 = vmatprep.subr.mxu0 %v1501_v29 }
 0x445   :  { %1320 = vmatpush3.msra.mxu0 %v1501_v29 }
 0x446   :  { %1321 = vmatprep.subr.mxu0 %v1507_v30 }
 0x447   :  { %1322 = vmatpush3.msra.mxu0 %v1507_v30 }
 0x448   :  { %1323 = vmatprep.subr.mxu0 %v1511_v31 }
 0x449   :  { %1324 = vmatpush3.msra.mxu0 %v1511_v31 }
 0x44a   :  { %1326 = vmatmul.mubr.msk.f32.vlgmr.msra.gmra.mxu0 %vm254_vm1, %v715_v32  ;;  %1339 = vmatprep.subr.mxu0 %v1426_v36 }
 0x44b   :  { %1340 = vmatpush3.msra.mxu0 %v1529_v37  ;;  %1347 = vmatprep.mubr.msk.f32.mxu0 %vm1427_vm2, %v1426_v36 }
 0x44c   :  { %1341 = vmatprep.subr.mxu0 %v1426_v36 }
 0x44d   :  { %1342 = vmatpush3.msra.mxu0 %v1534_v38 }
 0x44e   :  { %1343 = vmatprep.subr.mxu0 %v1426_v36 }
 0x44f   :  { %1344 = vmatpush3.msra.mxu0 %v1538_v39 }
 0x450   :  { %1345 = vmatprep.subr.mxu0 %v1426_v36 }
 0x451   :  { %1346 = vmatpush3.msra.mxu0 %v1542_v40 }
 0x47c   :  { %v584_v14 = vpop.f32.mrf.mxu1 }
 0x47d   :  { %v585_v15 = vadd.f32 %v584_v14, %v44_v11 }
 0x47e   :  { %v1302_v28 = vpop.f32.mrf.mxu1 }
 0x47f   :  { %588 = vst [vmem:[#allocation5] sm:$0x1] %v585_v15 }
 0x502   :  { %v1316_v29 = vpop.f32.mrf.mxu0 }
 0x504   :  { %v782_v30 = vpop.f32.mrf.mxu0 }
 0x505   :  { %1336 = vmatprep.mubr.msk.f32.mxu1 %vm254_vm1, %v782_v30 }
 0x506   :  { %1337 = vmatmul.mubr.msk.f32.vlgmr.msra.gmra.mxu1 %vm254_vm1, %v1316_v29 }
 0x507   :  { %1351 = vmatpush3.msra.mxu1 %v1550_v41  ;;  %1366 = vmatprep.mubr.msk.f32.mxu1 %vm1427_vm2, %v1426_v36 }
 0x508   :  { %1352 = vmatprep.subr.mxu1 %v1426_v36 }
 0x509   :  { %1353 = vmatpush3.msra.mxu1 %v1552_v42 }
 0x50a   :  { %1354 = vmatprep.subr.mxu1 %v1426_v36  ;;  %v1327_v31 = vpop.f32.mrf.mxu0 }
 0x50b   :  { %1355 = vmatpush3.msra.mxu1 %v1556_v43  ;;  %v877_v37 = vadd.f32 %v1327_v31, %v1570_v47 }
 0x50c   :  { %1356 = vmatprep.subr.mxu1 %v1426_v36  ;;  %v867_v35 = vpop.f32.mrf.mxu0 }
 0x50d   :  { %1357 = vmatpush3.msra.mxu1 %v1560_v44  ;;  %v876_v39 = vadd.f32 %v1570_v47, %v867_v35 }
 0x50e   :  { %1358 = vmatprep.subr.mxu1 %v1426_v36 }
 0x50f   :  { %1359 = vmatpush3.msra.mxu1 %v1564_v45 }
 0x510   :  { %1360 = vmatprep.subr.mxu1 %v1426_v36 }
 0x511   :  { %1361 = vmatpush3.msra.mxu1 %v1589_v4 }
 0x512   :  { %1362 = vmatprep.subr.mxu1 %v1426_v36 }
 0x513   :  { %1363 = vmatpush3.msra.mxu1 %v1593_v5 }
 0x514   :  { %1364 = vmatprep.subr.mxu1 %v1426_v36 }
 0x515   :  { %1365 = vmatpush3.msra.mxu1 %v1597_v6 }
 0x5c6   :  { %v1338_v38 = vpop.f32.mrf.mxu1 }
 0x5c7   :  { %v964_v40 = vadd.f32 %v1338_v38, %v877_v37 }
 0x5c8   :  { %v954_v41 = vpop.f32.mrf.mxu1 }
 0x5c9   :  { %v966_v42 = vmax.f32 %v964_v40, 0.0  ;;  %v963_v43 = vadd.f32 %v954_v41, %v876_v39 }
 0x5cb   :  { %v965_v44 = vmax.f32 %v963_v43, 0.0  ;;  %v968_v45 = vsel %vm254_vm1, %v966_v42, -inf }
 0x5cd   :  { %v967_v46 = vsel %vm254_vm1, %v965_v44, -inf }
 0x5ce   :  { %v969_v48 = vmax.f32 %v967_v46, %v968_v45 }
 0x5d0   :  { %v970_v36 = vrot.slane %v969_v48, 4 }
 0x5d2   :  { %v971_v49 = vmax.f32 %v969_v48, %v970_v36 }
 0x5d4   :  { %v972_v50 = vrot.slane %v971_v49, 2 }
 0x5d6   :  { %v973_v51 = vmax.f32 %v971_v49, %v972_v50 }
 0x5d8   :  { %v974_v52 = vrot.slane %v973_v51, 1 }
 0x5da   :  { %v975_v53 = vmax.f32 %v973_v51, %v974_v52 }
 0x5dc   :  { %1348 = vmatmul.mubr.msk.f32.vlgmr.msra.gmra.mxu0 %vm254_vm1, %v975_v53 }
 0x69c   :  { %v1045_v54 = vpop.f32.mrf.mxu0 }
 0x69d   :  { %v1046_v47 = vadd.f32 %v1045_v54, %v1601_v7 }
 0x69e   :  { %v1349_v55 = vpop.f32.mrf.mxu0 }
 0x69f   :  { %v1049_v56 = vmax.f32 %v1046_v47, 0.0 }
 0x6a1   :  { %1367 = vmatmul.mubr.msk.f32.vlgmr.msra.gmra.mxu1 %vm514_vm3, %v1049_v56 }
 0x761   :  { %v1119_v57 = vpop.f32.mrf.mxu1 }
 0x762   :  { %v1120_v58 = vadd.f32 %v1119_v57, %v44_v11 }
 0x763   :  { %v1368_v59 = vpop.f32.mrf.mxu1 }
 0x764   :  { %1123 = vst [vmem:[#allocation5 + $0x1] sm:$0x1] %v1120_v58 }
 0x765   :  { %1409 = shalt.err (!%p1406_p9)
}
 0x766   :  { %1133 = dma.vmem_to_hbm [thread:$0]  %s1131_s6, 32, %s1672_s3, [#allocation4]  }
 0x767   :  { %1420 = dma.done.wait [#allocation4], 32  }
 0x768   :  { %1421 = vsyncadd [#allocation4], 4294967264 }
 0x769   :  { %1137 = vsyncpa [#allocation3], 1 }
 0x76a   :  { %1138 = vsyncpa [#allocation4], 1 }

</bundles_post_ra>
